<compile_context>
chip_gen: v6e
topology: v6e:2x2x1
jax: 0.10.0
libtpu: 0.0.40
codegen_flags: <defaults>
</compile_context>

<pallas_src>
import functools
import math
from collections import deque

import jax
import jax.numpy as jnp
from jax.experimental import pallas as pl
from jax.experimental.pallas import tpu as pltpu


def _lif_kernel(inv_n_ref, x_ref, v_ref, hist_ref, old_ref,
                spikes_ref, v_out_ref, rate_ref, hist_out_ref,
                *, threshold: float, leak_rate: float):
    """One LIF timestep on a (TR, LANES) f32 tile (pure VPU elementwise).

    inv_n_ref : SMEM (1,) f32 -> 1 / min(len(history)+1, 10)
    x_ref     : input current tile
    v_ref     : previous membrane potential tile (donated -> v_out_ref)
    hist_ref  : running sum of the last <=9 previous spike maps (donated)
    old_ref   : spike map falling out of the 10-wide window (zeros if none)
    """
    x = x_ref[...]
    v = (1.0 - leak_rate) * v_ref[...] + leak_rate * x
    spikes = (v >= threshold).astype(jnp.float32)

    v_out_ref[...] = v * (1.0 - spikes)
    spikes_ref[...] = spikes

    window_sum = hist_ref[...] + spikes            # last <=10 spikes incl. current
    rate_ref[...] = window_sum * inv_n_ref[0]
    # Running "previous <=9 spikes" sum for the next step.
    hist_out_ref[...] = window_sum - old_ref[...]


def _plan_layout(total: int):
    """Pick a lane-dense slab layout (rows_pad, lanes) and a row tile."""
    lanes = 128
    while lanes < 1024 and total >= (2 * lanes) * 8:
        lanes *= 2
    rows = -(-total // lanes)                       # cdiv
    # Row tile: multiple of 8, each (tr, lanes) f32 tile <= 1 MiB so that
    # 8 tensors x double buffering stays ~16 MiB of VMEM (fits v5e/v6e/v7x).
    max_tr = max(8, (1 << 20) // (lanes * 4))
    tr = min(256, max_tr, ((rows + 7) // 8) * 8)
    tr = max(8, (tr // 8) * 8)
    rows_pad = -(-rows // tr) * tr
    return rows_pad, lanes, tr


@functools.lru_cache(maxsize=None)
def _build_step(rows_pad: int, lanes: int, tr: int,
                threshold: float, leak_rate: float):
    grid = (rows_pad // tr,)
    tile_spec = pl.BlockSpec((tr, lanes), lambda i: (i, 0))
    out_sds = jax.ShapeDtypeStruct((rows_pad, lanes), jnp.float32)
    n_bytes = rows_pad * lanes * 4

    return pl.pallas_call(
        functools.partial(_lif_kernel,
                          threshold=float(threshold),
                          leak_rate=float(leak_rate)),
        grid=grid,
        in_specs=[
            pl.BlockSpec(memory_space=pltpu.MemorySpace.SMEM),  # 1/window scalar
            tile_spec,   # x
            tile_spec,   # membrane potential (donated -> output 1)
            tile_spec,   # running history sum (donated -> output 3)
            tile_spec,   # spike map dropping out of the window (or zeros)
        ],
        out_specs=(tile_spec, tile_spec, tile_spec, tile_spec),
        out_shape=(out_sds, out_sds, out_sds, out_sds),
        input_output_aliases={2: 1, 3: 3},
        compiler_params=pltpu.CompilerParams(
            dimension_semantics=("parallel",),       # shard tiles across TCs (v7x)
            vmem_limit_bytes=32 * 1024 * 1024),
        cost_estimate=pl.CostEstimate(
            flops=9 * rows_pad * lanes,
            transcendentals=0,
            bytes_accessed=8 * n_bytes),
    )


class SpikingNeuron:
    """Stateful wrapper mirroring the PyTorch module; hot path is a Pallas kernel."""

    def __init__(self, threshold: float = 1.0, leak_rate: float = 0.1):
        self.threshold = float(threshold)
        self.leak_rate = float(leak_rate)
        self.membrane_potential = None        # (rows_pad, lanes) slab, donated each step
        self.spike_history = []               # NCHW spikes, capped at 100 (PyTorch parity)
        self._hist_sum = None                 # slab: sum of last <=9 previous spike maps
        self._slab_history = deque(maxlen=9)  # last <=9 previous spike slabs
        self._zeros_slab = None
        self._layout = None

    def reset_state(self):
        self.membrane_potential = None
        self.spike_history = []
        self._hist_sum = None
        self._slab_history.clear()
        self._zeros_slab = None
        self._layout = None

    def _to_slab(self, x, rows_pad, lanes):
        flat = x.reshape(-1).astype(jnp.float32)
        pad = rows_pad * lanes - flat.shape[0]
        if pad:
            flat = jnp.pad(flat, (0, pad))
        return flat.reshape(rows_pad, lanes)

    @staticmethod
    def _from_slab(slab, shape, total):
        return slab.reshape(-1)[:total].reshape(shape)

    def __call__(self, x):
        shape = x.shape
        total = math.prod(shape)

        if self._layout is None:
            self._layout = _plan_layout(total)
        rows_pad, lanes, tr = self._layout

        if self.membrane_potential is None:
            self.membrane_potential = jnp.zeros((rows_pad, lanes), jnp.float32)
        if self._hist_sum is None:
            self._hist_sum = jnp.zeros((rows_pad, lanes), jnp.float32)
        if self._zeros_slab is None:
            self._zeros_slab = jnp.zeros((rows_pad, lanes), jnp.float32)

        x_slab = self._to_slab(x, rows_pad, lanes)
        oldest = (self._slab_history[0] if len(self._slab_history) == 9
                  else self._zeros_slab)
        window = min(len(self.spike_history) + 1, 10)
        inv_n = jnp.array([1.0 / window], dtype=jnp.float32)

        step = _build_step(rows_pad, lanes, tr, self.threshold, self.leak_rate)
        spikes_slab, v_slab, rate_slab, hist_slab = step(
            inv_n, x_slab, self.membrane_potential, self._hist_sum, oldest)

        # Update in-place-donated state.
        self.membrane_potential = v_slab
        self._hist_sum = hist_slab
        self._slab_history.append(spikes_slab)

        spikes = self._from_slab(spikes_slab, shape, total)
        firing_rate = self._from_slab(rate_slab, shape, total)

        self.spike_history.append(spikes)
        if len(self.spike_history) > 100:
            self.spike_history.pop(0)

        return spikes, firing_rate


if __name__ == "__main__":
    key = jax.random.PRNGKey(0)
    n, c, h, w = 2, 4, 16, 16
    keys = jax.random.split(key, 3)
    xs = [jax.random.uniform(k, (n, c, h, w), dtype=jnp.float32) * 12.0
          for k in keys]

    neuron = SpikingNeuron(threshold=1.0, leak_rate=0.1)

    # Pure-JAX reference replicating the PyTorch forward semantics step by step.
    v_ref = jnp.zeros((n, c, h, w), jnp.float32)
    hist_ref = []
    ok = True
    for x in xs:
        spikes, rate = neuron(x)
        jax.block_until_ready((spikes, rate))

        v_ref = (1.0 - neuron.leak_rate) * v_ref + neuron.leak_rate * x
        s_ref = (v_ref >= neuron.threshold).astype(jnp.float32)
        v_ref = v_ref * (1.0 - s_ref)
        hist_ref.append(s_ref)
        r_ref = jnp.mean(jnp.stack(hist_ref[-10:]), axis=0)

        ok &= bool(jnp.allclose(spikes, s_ref))
        ok &= bool(jnp.allclose(rate, r_ref, atol=1e-6))

    assert ok, "mismatch vs pure-JAX reference"
    print("KERNEL_OK")
</pallas_src>

<mosaic_0001>
module attributes {stable_mosaic.version = 11 : i64} {
  func.func @_lif_kernel(%arg0: i32, %arg1: memref<1xf32, #tpu.memory_space<smem>>, %arg2: memref<8x256xf32, #tpu.memory_space<vmem>>, %arg3: memref<8x256xf32, #tpu.memory_space<vmem>>, %arg4: memref<8x256xf32, #tpu.memory_space<vmem>>, %arg5: memref<8x256xf32, #tpu.memory_space<vmem>>, %arg6: memref<8x256xf32, #tpu.memory_space<vmem>>, %arg7: memref<8x256xf32, #tpu.memory_space<vmem>>, %arg8: memref<8x256xf32, #tpu.memory_space<vmem>>, %arg9: memref<8x256xf32, #tpu.memory_space<vmem>>) attributes {dimension_semantics = [#tpu.dimension_semantics<parallel>], iteration_bounds = array<i64: 1>, scalar_prefetch = 0 : i64, scratch_operands = 0 : i64, tpu.core_type = #tpu.core_type<tc>, window_params = [{transform_indices = @transform_0, window_bounds = array<i64: 1>}, {transform_indices = @transform_1, window_bounds = array<i64: 8, 256>}, {transform_indices = @transform_2, window_bounds = array<i64: 8, 256>}, {transform_indices = @transform_3, window_bounds = array<i64: 8, 256>}, {transform_indices = @transform_4, window_bounds = array<i64: 8, 256>}, {transform_indices = @transform_5, window_bounds = array<i64: 8, 256>}, {transform_indices = @transform_6, window_bounds = array<i64: 8, 256>}, {transform_indices = @transform_7, window_bounds = array<i64: 8, 256>}, {transform_indices = @transform_8, window_bounds = array<i64: 8, 256>}]} {
    %c0 = arith.constant 0 : index
    %c0_0 = arith.constant 0 : index
    %0 = vector.load %arg2[%c0, %c0_0] : memref<8x256xf32, #tpu.memory_space<vmem>>, vector<8x256xf32>
    %c0_1 = arith.constant 0 : index
    %c0_2 = arith.constant 0 : index
    %1 = vector.load %arg3[%c0_1, %c0_2] : memref<8x256xf32, #tpu.memory_space<vmem>>, vector<8x256xf32>
    %cst = arith.constant 0.899999976 : f32
    %2 = vector.broadcast %cst : f32 to vector<8x256xf32>
    %3 = arith.mulf %2, %1 : vector<8x256xf32>
    %cst_3 = arith.constant 1.000000e-01 : f32
    %4 = vector.broadcast %cst_3 : f32 to vector<8x256xf32>
    %5 = arith.mulf %4, %0 : vector<8x256xf32>
    %6 = arith.addf %3, %5 : vector<8x256xf32>
    %cst_4 = arith.constant 1.000000e+00 : f32
    %7 = vector.broadcast %cst_4 : f32 to vector<8x256xf32>
    %8 = arith.cmpf oge, %6, %7 : vector<8x256xf32>
    %9 = arith.extui %8 : vector<8x256xi1> to vector<8x256xi32>
    %10 = arith.sitofp %9 : vector<8x256xi32> to vector<8x256xf32>
    %cst_5 = arith.constant 1.000000e+00 : f32
    %11 = vector.broadcast %cst_5 : f32 to vector<8x256xf32>
    %12 = arith.subf %11, %10 : vector<8x256xf32>
    %13 = arith.mulf %6, %12 : vector<8x256xf32>
    %c0_6 = arith.constant 0 : index
    %c0_7 = arith.constant 0 : index
    %14 = vector.load %arg7[%c0_6, %c0_7] : memref<8x256xf32, #tpu.memory_space<vmem>>, vector<8x256xf32>
    tpu.vector_store %arg7[%c0_6, %c0_7], %13 {strides = array<i32>} : memref<8x256xf32, #tpu.memory_space<vmem>>, vector<8x256xf32>,
    %c0_8 = arith.constant 0 : index
    %c0_9 = arith.constant 0 : index
    %15 = vector.load %arg6[%c0_8, %c0_9] : memref<8x256xf32, #tpu.memory_space<vmem>>, vector<8x256xf32>
    tpu.vector_store %arg6[%c0_8, %c0_9], %10 {strides = array<i32>} : memref<8x256xf32, #tpu.memory_space<vmem>>, vector<8x256xf32>,
    %c0_10 = arith.constant 0 : index
    %c0_11 = arith.constant 0 : index
    %16 = vector.load %arg4[%c0_10, %c0_11] : memref<8x256xf32, #tpu.memory_space<vmem>>, vector<8x256xf32>
    %17 = arith.addf %16, %10 : vector<8x256xf32>
    %c0_12 = arith.constant 0 : index
    %18 = memref.load %arg1[%c0_12] : memref<1xf32, #tpu.memory_space<smem>>
    %19 = vector.broadcast %18 : f32 to vector<8x256xf32>
    %20 = arith.mulf %17, %19 : vector<8x256xf32>
    %c0_13 = arith.constant 0 : index
    %c0_14 = arith.constant 0 : index
    %21 = vector.load %arg8[%c0_13, %c0_14] : memref<8x256xf32, #tpu.memory_space<vmem>>, vector<8x256xf32>
    tpu.vector_store %arg8[%c0_13, %c0_14], %20 {strides = array<i32>} : memref<8x256xf32, #tpu.memory_space<vmem>>, vector<8x256xf32>,
    %c0_15 = arith.constant 0 : index
    %c0_16 = arith.constant 0 : index
    %22 = vector.load %arg5[%c0_15, %c0_16] : memref<8x256xf32, #tpu.memory_space<vmem>>, vector<8x256xf32>
    %23 = arith.subf %17, %22 : vector<8x256xf32>
    %c0_17 = arith.constant 0 : index
    %c0_18 = arith.constant 0 : index
    %24 = vector.load %arg9[%c0_17, %c0_18] : memref<8x256xf32, #tpu.memory_space<vmem>>, vector<8x256xf32>
    tpu.vector_store %arg9[%c0_17, %c0_18], %23 {strides = array<i32>} : memref<8x256xf32, #tpu.memory_space<vmem>>, vector<8x256xf32>,
    return
  }
  func.func @transform_0(%arg0: i32) -> i32 {
    %c0_i32 = arith.constant 0 : i32
    %c0_i32_0 = arith.constant 0 : i32
    return %c0_i32 : i32
  }
  func.func @transform_1(%arg0: i32) -> (i32, i32) {
    %c0_i32 = arith.constant 0 : i32
    %c0_i32_0 = arith.constant 0 : i32
    return %arg0, %c0_i32 : i32, i32
  }
  func.func @transform_2(%arg0: i32) -> (i32, i32) {
    %c0_i32 = arith.constant 0 : i32
    %c0_i32_0 = arith.constant 0 : i32
    return %arg0, %c0_i32 : i32, i32
  }
  func.func @transform_3(%arg0: i32) -> (i32, i32) {
    %c0_i32 = arith.constant 0 : i32
    %c0_i32_0 = arith.constant 0 : i32
    return %arg0, %c0_i32 : i32, i32
  }
  func.func @transform_4(%arg0: i32) -> (i32, i32) {
    %c0_i32 = arith.constant 0 : i32
    %c0_i32_0 = arith.constant 0 : i32
    return %arg0, %c0_i32 : i32, i32
  }
  func.func @transform_5(%arg0: i32) -> (i32, i32) {
    %c0_i32 = arith.constant 0 : i32
    %c0_i32_0 = arith.constant 0 : i32
    return %arg0, %c0_i32 : i32, i32
  }
  func.func @transform_6(%arg0: i32) -> (i32, i32) {
    %c0_i32 = arith.constant 0 : i32
    %c0_i32_0 = arith.constant 0 : i32
    return %arg0, %c0_i32 : i32, i32
  }
  func.func @transform_7(%arg0: i32) -> (i32, i32) {
    %c0_i32 = arith.constant 0 : i32
    %c0_i32_0 = arith.constant 0 : i32
    return %arg0, %c0_i32 : i32, i32
  }
  func.func @transform_8(%arg0: i32) -> (i32, i32) {
    %c0_i32 = arith.constant 0 : i32
    %c0_i32_0 = arith.constant 0 : i32
    return %arg0, %c0_i32 : i32, i32
  }
}

</mosaic_0001>

<bundles_post_ra>
// kernel: tpu_custom_call.1
= control target key start
LH: loop header
LB: loop body
LE: loop exit
PB: predicated region body
PF: predicated region fallthrough
CT: control target
= control target key end

     0   :  { %15 = vsyncpa [#allocation4], 0  ;;  %s373_s0 = inlined_call_operand.<no memory space> [shape: f32[1], index: 0, kind: input, shape index: {}]   ;;  %s374_s1 = inlined_call_operand.vmem [shape: f32[8,256], index: 1, kind: input, shape index: {}]   ;;  %s375_s2 = inlined_call_operand.hbm [shape: f32[8,256], index: 2, kind: input, shape index: {}, may-alias: {2,6}]   ;;  %s376_s3 = inlined_call_operand.hbm [shape: f32[8,256], index: 3, kind: input, shape index: {}, may-alias: {3,8}]   ;;  %s377_s4 = inlined_call_operand.vmem [shape: f32[8,256], index: 4, kind: input, shape index: {}]   ;;  %s378_s5 = inlined_call_operand.hbm [shape: f32[8,256], index: 5, kind: output, shape index: {0}]   ;;  %s379_s6 = inlined_call_operand.hbm [shape: f32[8,256], index: 6, kind: output, shape index: {1}, may-alias: {2,6}]   ;;  %s380_s7 = inlined_call_operand.hbm [shape: f32[8,256], index: 7, kind: output, shape index: {2}]   ;;  %s381_s8 = inlined_call_operand.hbm [shape: f32[8,256], index: 8, kind: output, shape index: {3}, may-alias: {3,8}]  }
   0x1   :  { %16 = vsyncpa [#allocation7], 0 }
   0x2   :  { %17 = vsyncpa [#allocation5], 0 }
   0x3   :  { %18 = vsyncpa [#allocation10], 0 }
   0x4   :  { %19 = vsyncpa [#allocation13], 0  ;;  %s288_s27 = smov [#allocation3]   ;;  %s289_s29 = smov [#allocation6]  }
   0x5   :  { %s30_s28 = sshll.u32 %s288_s27, 4  ;;  %s40_s30 = sshll.u32 %s289_s29, 4  ;;  %s31_s28 = int_to_ptr.vmem [resolvable:$true] %s30_s28  ;;  %s41_s30 = int_to_ptr.vmem [resolvable:$true] %s40_s30 }
   0x6   :  { %s166_s9 = scalar_lea.vmem %s31_s28, 256  ;;  %p171_p1 = scmp.lt.s32.totalorder %s31_s28, %s31_s28 }
   0x7   :  { %p167_p0 = scmp.ne.s32.totalorder %s31_s28, %s166_s9  ;;  %p172_p2 = scmp.lt.s32.totalorder %s166_s9, %s166_s9 }
   0x9   :  { %p173_p3 = por %p172_p2, %p171_p1 }
   0xb   :  { %p174_p4 = pnand %p173_p3, %p167_p0 }
   0xd   :  { %177 = shalt.err (!%p174_p4)
}
   0xe   :  { %33 = dma.hbm_to_vmem [thread:$0]  %s375_s2, 256, %s31_s28, [#allocation4]  }
   0xf   :  { %s186_s12 = scalar_lea.vmem %s41_s30, 256  ;;  %p191_p6 = scmp.lt.s32.totalorder %s41_s30, %s41_s30 }
  0x10   :  { %p187_p5 = scmp.ne.s32.totalorder %s41_s30, %s186_s12  ;;  %p192_p7 = scmp.lt.s32.totalorder %s186_s12, %s186_s12 }
  0x12   :  { %p193_p8 = por %p192_p7, %p191_p6 }
  0x14   :  { %p194_p9 = pnand %p193_p8, %p187_p5 }
  0x16   :  { %197 = shalt.err (!%p194_p9)
}
  0x17   :  { %43 = dma.hbm_to_vmem [thread:$0]  %s376_s3, 256, %s41_s30, [#allocation7]  }
  0x18   :  { %278 = dma.done.wait [#allocation4], 256  }
  0x19   :  { %279 = vsyncadd [#allocation4], 4294967040 }
  0x1a   :  { %280 = dma.done.wait [#allocation7], 256  }
  0x1b   :  { %281 = vsyncadd [#allocation7], 4294967040  ;;  %v52_v0 = vld [vmem:[%s374_s1] sm:$0xff]  ;;  %v53_v2 = vld [vmem:[%s374_s1 + $0x8] sm:$0xff]  ;;  %s290_s3 = smov [#allocation8]   ;;  %v291_v12 = vmov 0.0   ;;  %v81_v14 = vstv %s373_s0 }
  0x1c   :  { %v54_v1 = vld [vmem:[#allocation3] sm:$0xff]  ;;  %v58_v4 = vmul.f32 0.1, %v52_v0  ;;  %v55_v5 = vld [vmem:[#allocation3 + $0x8] sm:$0xff]  ;;  %v59_v7 = vmul.f32 0.1, %v53_v2 }
  0x1d   :  { %v56_v3 = vmul.f32 0.9, %v54_v1  ;;  %v57_v6 = vmul.f32 0.9, %v55_v5  ;;  %s98_s18 = sshll.u32 %s290_s3, 4  ;;  %v76_v10 = vld [vmem:[#allocation6] sm:$0xff]  ;;  %s99_s18 = int_to_ptr.vmem [resolvable:$true] %s98_s18 }
  0x1e   :  { %v77_v11 = vld [vmem:[#allocation6 + $0x8] sm:$0xff]  ;;  %v86_v15 = vld [vmem:[%s377_s4] sm:$0xff]  ;;  %v87_v19 = vld [vmem:[%s377_s4 + $0x8] sm:$0xff]  ;;  %s292_s24 = smov [#allocation9]   ;;  %s293_s26 = smov [#allocation11]  }
  0x1f   :  { %v60_v8 = vadd.f32 %v58_v4, %v56_v3  ;;  %v61_v9 = vadd.f32 %v59_v7, %v57_v6  ;;  %s108_s25 = sshll.u32 %s292_s24, 4  ;;  %s118_s0 = sshll.u32 %s293_s26, 4  ;;  %s109_s25 = int_to_ptr.vmem [resolvable:$true] %s108_s25  ;;  %s119_s0 = int_to_ptr.vmem [resolvable:$true] %s118_s0 }
  0x20   :  { %s294_s27 = smov [#allocation12]   ;;  %s198_s29 = scalar_lea.vmem %s99_s18, 256 }
  0x21   :  { %vm62_vm0 = vcmp.ge.f32.partialorder %v60_v8, 1.0  ;;  %vm63_vm1 = vcmp.ge.f32.partialorder %v61_v9, 1.0  ;;  %s128_s28 = sshll.u32 %s294_s27, 4  ;;  %p199_p10 = scmp.ne.s32.totalorder %s99_s18, %s198_s29  ;;  %s129_s28 = int_to_ptr.vmem [resolvable:$true] %s128_s28 }
  0x22   :  { %v149_v13 = vsel %vm62_vm0, 1.0, %v291_v12  ;;  %v150_v17 = vsel %vm63_vm1, 1.0, %v291_v12  ;;  %p203_p11 = scmp.lt.s32.totalorder %s99_s18, %s99_s18  ;;  %p204_p12 = scmp.lt.s32.totalorder %s198_s29, %s198_s29 }
  0x23   :  { %v68_v16 = vsub.f32 1.0, %v149_v13  ;;  %74 = vst [vmem:[#allocation8] sm:$0xff] %v149_v13  ;;  %v78_v18 = vadd.f32 %v149_v13, %v76_v10  ;;  %v69_v20 = vsub.f32 1.0, %v150_v17  ;;  %75 = vst [vmem:[#allocation8 + $0x8] sm:$0xff] %v150_v17  ;;  %v79_v21 = vadd.f32 %v150_v17, %v77_v11 }
  0x24   :  { %p205_p13 = por %p204_p12, %p203_p11 }
  0x25   :  { %v70_v22 = vmul.f32 %v68_v16, %v60_v8  ;;  %v82_v23 = vmul.f32 %v81_v14, %v78_v18  ;;  %v88_v24 = vsub.f32 %v78_v18, %v86_v15 }
  0x26   :  { %p206_p0 = pnand %p205_p13, %p199_p10 }
  0x28   :  { %209 = shalt.err (!%p206_p0)
}
  0x29   :  { %101 = dma.vmem_to_hbm [thread:$0]  %s99_s18, 256, %s378_s5, [#allocation5]   ;;  %v71_v25 = vmul.f32 %v69_v20, %v61_v9  ;;  %v83_v26 = vmul.f32 %v81_v14, %v79_v21  ;;  %v89_v27 = vsub.f32 %v79_v21, %v87_v19  ;;  %72 = vst [vmem:[#allocation9] sm:$0xff] %v70_v22  ;;  %84 = vst [vmem:[#allocation11] sm:$0xff] %v82_v23 }
  0x2a   :  { %90 = vst [vmem:[#allocation12] sm:$0xff] %v88_v24  ;;  %s218_s9 = scalar_lea.vmem %s109_s25, 256  ;;  %p223_p2 = scmp.lt.s32.totalorder %s109_s25, %s109_s25 }
  0x2b   :  { %73 = vst [vmem:[#allocation9 + $0x8] sm:$0xff] %v71_v25  ;;  %85 = vst [vmem:[#allocation11 + $0x8] sm:$0xff] %v83_v26  ;;  %p219_p1 = scmp.ne.s32.totalorder %s109_s25, %s218_s9  ;;  %p224_p3 = scmp.lt.s32.totalorder %s218_s9, %s218_s9 }
  0x2c   :  { %91 = vst [vmem:[#allocation12 + $0x8] sm:$0xff] %v89_v27 }
  0x2d   :  { %p225_p4 = por %p224_p3, %p223_p2 }
  0x2f   :  { %p226_p5 = pnand %p225_p4, %p219_p1 }
  0x31   :  { %229 = shalt.err (!%p226_p5)
}
  0x32   :  { %111 = dma.vmem_to_hbm [thread:$0]  %s109_s25, 256, %s379_s6, [#allocation10]  }
  0x33   :  { %s238_s11 = scalar_lea.vmem %s119_s0, 256  ;;  %p243_p7 = scmp.lt.s32.totalorder %s119_s0, %s119_s0 }
  0x34   :  { %p239_p6 = scmp.ne.s32.totalorder %s119_s0, %s238_s11  ;;  %p244_p8 = scmp.lt.s32.totalorder %s238_s11, %s238_s11 }
  0x36   :  { %p245_p9 = por %p244_p8, %p243_p7 }
  0x38   :  { %p246_p10 = pnand %p245_p9, %p239_p6 }
  0x3a   :  { %249 = shalt.err (!%p246_p10)
}
  0x3b   :  { %121 = dma.vmem_to_hbm [thread:$0]  %s119_s0, 256, %s380_s7, [#allocation10]  }
  0x3c   :  { %s258_s14 = scalar_lea.vmem %s129_s28, 256  ;;  %p263_p12 = scmp.lt.s32.totalorder %s129_s28, %s129_s28 }
  0x3d   :  { %p259_p11 = scmp.ne.s32.totalorder %s129_s28, %s258_s14  ;;  %p264_p13 = scmp.lt.s32.totalorder %s258_s14, %s258_s14 }
  0x3f   :  { %p265_p0 = por %p264_p13, %p263_p12 }
  0x41   :  { %p266_p1 = pnand %p265_p0, %p259_p11 }
  0x43   :  { %269 = shalt.err (!%p266_p1)
}
  0x44   :  { %131 = dma.vmem_to_hbm [thread:$0]  %s129_s28, 256, %s381_s8, [#allocation13]  }
  0x45   :  { %282 = dma.done.wait [#allocation5], 256  }
  0x46   :  { %283 = vsyncadd [#allocation5], 4294967040 }
  0x47   :  { %284 = dma.done.wait [#allocation10], 512  }
  0x48   :  { %285 = vsyncadd [#allocation10], 4294966784 }
  0x49   :  { %286 = dma.done.wait [#allocation13], 256  }
  0x4a   :  { %287 = vsyncadd [#allocation13], 4294967040 }
  0x4b   :  { %144 = vsyncpa [#allocation4], 1 }
  0x4c   :  { %145 = vsyncpa [#allocation7], 1 }
  0x4d   :  { %146 = vsyncpa [#allocation5], 1 }
  0x4e   :  { %147 = vsyncpa [#allocation10], 1 }
  0x4f   :  { %148 = vsyncpa [#allocation13], 1 }

</bundles_post_ra>
